<compile_context>
chip_gen: v7x
topology: tpu7x:2x2x1
jax: 0.10.0
libtpu: 0.0.40
codegen_flags: <defaults>
</compile_context>

<pallas_src>
import functools

import jax
import jax.numpy as jnp
from jax.experimental import pallas as pl
from jax.experimental.pallas import tpu as pltpu

LANES = 128
MAX_TILE_ROWS = 2048  # (2048, 128) f32 block = 1 MiB/input; 2 inputs x 2 buffers = 4 MiB VMEM


def _charbonnier_block_kernel(x_ref, y_ref, o_ref, *, eps):
    x = x_ref[...].astype(jnp.float32)
    y = y_ref[...].astype(jnp.float32)
    d = x - y
    v = jnp.sqrt(d * d + jnp.float32(eps))
    # (tile_rows, 128) -> (tile_rows//8, 8, 128) is a free reshape (rows already map
    # to sublane groups of 8); summing over axis 0 is pure VALU vreg adds (no XLU).
    o_ref[...] = v.reshape(-1, 8, LANES).sum(axis=0)


def charbonnier_loss(x, y, eps=1e-6):
    """Pallas TPU implementation of CharbonnierLoss.forward (sum reduction, scalar)."""
    assert x.shape == y.shape, "x and y must have the same shape"
    n = x.size
    out_dtype = x.dtype

    xf = x.reshape(-1)
    yf = y.reshape(-1)

    rows = n // LANES
    rem = n - rows * LANES

    # Tile rows: as large as possible (multiple of 8), capped at MAX_TILE_ROWS.
    tile_rows = min(MAX_TILE_ROWS, (rows // 8) * 8)
    num_blocks = rows // tile_rows if tile_rows > 0 else 0
    rows_covered = num_blocks * tile_rows
    n_covered = rows_covered * LANES

    total = jnp.zeros((), jnp.float32)

    if num_blocks > 0:
        if rem == 0:
            # Common case: numel is a multiple of 128 -> reshape is a free view.
            x2d = xf.reshape(rows, LANES)
            y2d = yf.reshape(rows, LANES)
        else:
            # Uncommon case: one copy to get a lane-aligned 2-D view of the prefix.
            x2d = xf[: rows * LANES].reshape(rows, LANES)
            y2d = yf[: rows * LANES].reshape(rows, LANES)

        kernel = functools.partial(_charbonnier_block_kernel, eps=eps)
        n_main = rows_covered * LANES
        bytes_in = 2 * n_main * x.dtype.itemsize
        bytes_out = num_blocks * 8 * LANES * 4

        partials = pl.pallas_call(
            kernel,
            out_shape=jax.ShapeDtypeStruct((num_blocks * 8, LANES), jnp.float32),
            grid_spec=pltpu.PrefetchScalarGridSpec(
                num_scalar_prefetch=0,
                grid=(num_blocks,),
                in_specs=[
                    pl.BlockSpec((tile_rows, LANES), lambda i: (i, 0)),
                    pl.BlockSpec((tile_rows, LANES), lambda i: (i, 0)),
                ],
                out_specs=pl.BlockSpec((8, LANES), lambda i: (i, 0)),
            ),
            compiler_params=pltpu.CompilerParams(
                # Every grid step is independent (writes its own partial block), so
                # v7x megacore can shard the axis across both TensorCores.
                dimension_semantics=("parallel",),
            ),
            cost_estimate=pl.CostEstimate(
                flops=5 * n_main,
                transcendentals=n_main,
                bytes_accessed=bytes_in + bytes_out,
            ),
        )(x2d, y2d)

        total = total + jnp.sum(partials)

    if n_covered < n:
        # Tail: leftover rows that don't fill a whole tile plus the non-lane-aligned
        # remainder (< TILE_ROWS*128 + 128 elements). Plain jnp; fuses to one tiny op.
        xt = xf[n_covered:].astype(jnp.float32)
        yt = yf[n_covered:].astype(jnp.float32)
        dt = xt - yt
        total = total + jnp.sum(jnp.sqrt(dt * dt + jnp.float32(eps)))

    return total.astype(out_dtype)


if __name__ == "__main__":
    key = jax.random.PRNGKey(0)
    kx, ky = jax.random.split(key)
    # NCHW like the PyTorch module would see.
    x = jax.random.normal(kx, (2, 4, 16, 16), dtype=jnp.float32)
    y = jax.random.normal(ky, (2, 4, 16, 16), dtype=jnp.float32)

    loss = jax.block_until_ready(charbonnier_loss(x, y, eps=1e-6))

    # Reference check in plain JAX.
    diff = x - y
    ref = jnp.sum(jnp.sqrt(diff * diff + 1e-6))
    assert jnp.allclose(loss, ref, rtol=1e-5, atol=1e-5), (loss, ref)

    print("KERNEL_OK")
</pallas_src>

<mosaic_0001>
module attributes {stable_mosaic.version = 11 : i64} {
  func.func @_charbonnier_block_kernel(%arg0: i32, %arg1: memref<16x128xf32, #tpu.memory_space<vmem>>, %arg2: memref<16x128xf32, #tpu.memory_space<vmem>>, %arg3: memref<8x128xf32, #tpu.memory_space<vmem>>) attributes {dimension_semantics = [#tpu.dimension_semantics<parallel>], iteration_bounds = array<i64: 1>, scalar_prefetch = 0 : i64, scratch_operands = 0 : i64, tpu.core_type = #tpu.core_type<tc>, window_params = [{transform_indices = @transform_0, window_bounds = array<i64: 16, 128>}, {transform_indices = @transform_1, window_bounds = array<i64: 16, 128>}, {transform_indices = @transform_2, window_bounds = array<i64: 8, 128>}]} {
    %c0 = arith.constant 0 : index
    %c0_0 = arith.constant 0 : index
    %0 = vector.load %arg1[%c0, %c0_0] : memref<16x128xf32, #tpu.memory_space<vmem>>, vector<16x128xf32>
    %c0_1 = arith.constant 0 : index
    %c0_2 = arith.constant 0 : index
    %1 = vector.load %arg2[%c0_1, %c0_2] : memref<16x128xf32, #tpu.memory_space<vmem>>, vector<16x128xf32>
    %2 = arith.subf %0, %1 : vector<16x128xf32>
    %3 = arith.mulf %2, %2 : vector<16x128xf32>
    %cst = arith.constant 9.99999997E-7 : f32
    %4 = vector.broadcast %cst : f32 to vector<16x128xf32>
    %5 = arith.addf %3, %4 : vector<16x128xf32>
    %6 = math.sqrt %5 : vector<16x128xf32>
    %7 = vector.shape_cast %6 : vector<16x128xf32> to vector<2x8x128xf32>
    %cst_3 = arith.constant dense<0.000000e+00> : vector<8x128xf32>
    %8 = vector.multi_reduction <add>, %7, %cst_3 [0] : vector<2x8x128xf32> to vector<8x128xf32>
    %c0_4 = arith.constant 0 : index
    %c0_5 = arith.constant 0 : index
    %9 = vector.load %arg3[%c0_4, %c0_5] : memref<8x128xf32, #tpu.memory_space<vmem>>, vector<8x128xf32>
    tpu.vector_store %arg3[%c0_4, %c0_5], %8 {strides = array<i32>} : memref<8x128xf32, #tpu.memory_space<vmem>>, vector<8x128xf32>,
    return
  }
  func.func @transform_0(%arg0: i32) -> (i32, i32) {
    %c0_i32 = arith.constant 0 : i32
    %c0_i32_0 = arith.constant 0 : i32
    return %arg0, %c0_i32 : i32, i32
  }
  func.func @transform_1(%arg0: i32) -> (i32, i32) {
    %c0_i32 = arith.constant 0 : i32
    %c0_i32_0 = arith.constant 0 : i32
    return %arg0, %c0_i32 : i32, i32
  }
  func.func @transform_2(%arg0: i32) -> (i32, i32) {
    %c0_i32 = arith.constant 0 : i32
    %c0_i32_0 = arith.constant 0 : i32
    return %arg0, %c0_i32 : i32, i32
  }
}

</mosaic_0001>

<bundles_post_ra>
// kernel: tpu_custom_call.1
= control target key start
LH: loop header
LB: loop body
LE: loop exit
PB: predicated region body
PF: predicated region fallthrough
CT: control target
= control target key end

     0   :  { %7 = vsyncpa [#allocation3], 0  ;;  %s219_s0 = inlined_call_operand.hbm [shape: f32[16,128], index: 0, kind: input, shape index: {}]   ;;  %s220_s1 = inlined_call_operand.hbm [shape: f32[16,128], index: 1, kind: input, shape index: {}]   ;;  %s221_s2 = inlined_call_operand.hbm [shape: f32[8,128], index: 2, kind: output, shape index: {}]  }
   0x1   :  { %8 = vsyncpa [#allocation6], 0 }
   0x2   :  { %9 = vsyncpa [#allocation4], 0  ;;  %s163_s9 = smov [#allocation2]   ;;  %s91_s13 = scalar_lea.hbm %s219_s0, 256 }
   0x3   :  { %s15_s10 = sshll.u32 %s163_s9, 4  ;;  %p92_p0 = scmp.ne.s32.totalorder %s219_s0, %s91_s13  ;;  %s16_s10 = int_to_ptr.vmem [resolvable:$true] %s15_s10 }
   0x4   :  { %p95_p1 = scmp.lt.u32.totalorder %s91_s13, %s219_s0 }
   0x6   :  { %p97_p2 = pnand %p95_p1, %p92_p0 }
   0x8   :  { %100 = shalt.err (!%p97_p2)
}
   0x9   :  { %s101_s18 = scalar_lea.vmem %s16_s10, 256  ;;  %p106_p4 = scmp.lt.s32.totalorder %s16_s10, %s16_s10 }
   0xa   :  { %p102_p3 = scmp.ne.s32.totalorder %s16_s10, %s101_s18  ;;  %p107_p5 = scmp.lt.s32.totalorder %s101_s18, %s101_s18 }
   0xc   :  { %p108_p6 = por %p107_p5, %p106_p4 }
   0xe   :  { %p109_p7 = pnand %p108_p6, %p102_p3 }
  0x10   :  { %112 = shalt.err (!%p109_p7)
}
  0x11   :  { %s164_s19 = smov 128   ;;  %s165_s20 = smov 8  }
  0x12   :  { %21 = dma.hbm_to_vmem [thread:$0]  %s219_s0, 256, %s16_s10, [#allocation3], %s164_s19, %s164_s19, %s165_s20  }
  0x13   :  { %s166_s23 = smov [#allocation5]   ;;  %s113_s27 = scalar_lea.hbm %s220_s1, 256 }
  0x14   :  { %s27_s24 = sshll.u32 %s166_s23, 4  ;;  %p114_p8 = scmp.ne.s32.totalorder %s220_s1, %s113_s27  ;;  %s28_s24 = int_to_ptr.vmem [resolvable:$true] %s27_s24 }
  0x15   :  { %p117_p9 = scmp.lt.u32.totalorder %s113_s27, %s220_s1 }
  0x17   :  { %p119_p10 = pnand %p117_p9, %p114_p8 }
  0x19   :  { %122 = shalt.err (!%p119_p10)
}
  0x1a   :  { %s123_s4 = scalar_lea.vmem %s28_s24, 256  ;;  %p128_p12 = scmp.lt.s32.totalorder %s28_s24, %s28_s24 }
  0x1b   :  { %p124_p11 = scmp.ne.s32.totalorder %s28_s24, %s123_s4  ;;  %p129_p13 = scmp.lt.s32.totalorder %s123_s4, %s123_s4 }
  0x1d   :  { %p130_p0 = por %p129_p13, %p128_p12 }
  0x1f   :  { %p131_p1 = pnand %p130_p0, %p124_p11 }
  0x21   :  { %134 = shalt.err (!%p131_p1)
}
  0x22   :  { %33 = dma.hbm_to_vmem [thread:$0]  %s220_s1, 256, %s28_s24, [#allocation6], %s164_s19, %s164_s19, %s165_s20  }
  0x23   :  { %157 = dma.done.wait [#allocation3], 256  }
  0x24   :  { %158 = vsyncadd [#allocation3], 4294967040 }
  0x25   :  { %159 = dma.done.wait [#allocation6], 256  }
  0x26   :  { %160 = vsyncadd [#allocation6], 4294967040  ;;  %v40_v0 = vld [vmem:[#allocation2] sm:$0xff]  ;;  %v41_v1 = vld [vmem:[#allocation2 + $0x8] sm:$0xff]  ;;  %s167_s1 = smov [#allocation7]  }
  0x27   :  { %v42_v2 = vld [vmem:[#allocation5] sm:$0xff]  ;;  %v43_v3 = vld [vmem:[#allocation5 + $0x8] sm:$0xff]  ;;  %s72_s6 = sshll.u32 %s167_s1, 4  ;;  %s73_s6 = int_to_ptr.vmem [resolvable:$true] %s72_s6 }
  0x28   :  { %v44_v4 = vsub.f32 %v40_v0, %v42_v2  ;;  %v45_v5 = vsub.f32 %v41_v1, %v43_v3  ;;  %s135_s7 = scalar_lea.vmem %s73_s6, 128  ;;  %p140_p3 = scmp.lt.s32.totalorder %s73_s6, %s73_s6 }
  0x29   :  { %p136_p2 = scmp.ne.s32.totalorder %s73_s6, %s135_s7  ;;  %p141_p4 = scmp.lt.s32.totalorder %s135_s7, %s135_s7 }
  0x2a   :  { %v46_v6 = vmul.f32 %v44_v4, %v44_v4  ;;  %v47_v7 = vmul.f32 %v45_v5, %v45_v5 }
  0x2b   :  { %p142_p5 = por %p141_p4, %p140_p3 }
  0x2c   :  { %v48_v8 = vadd.f32 1e-06, %v46_v6  ;;  %v49_v9 = vadd.f32 1e-06, %v47_v7 }
  0x2d   :  { %p143_p6 = pnand %p142_p5, %p136_p2 }
  0x2e   :  { %87 = vrsqrt.f32 %v48_v8  ;;  %vm52_vm0 = vcmp.eq.f32.partialorder %v48_v8, inf  ;;  %v55_v11 = vand.u32 2147483648, %v48_v8  ;;  %vm54_vm1 = vcmp.eq.f32.partialorder %v48_v8, 0.0 }
  0x2f   :  { %89 = vrsqrt.f32 %v49_v9  ;;  %vm59_vm2 = vcmp.eq.f32.partialorder %v49_v9, inf  ;;  %v62_v14 = vand.u32 2147483648, %v49_v9  ;;  %vm61_vm3 = vcmp.eq.f32.partialorder %v49_v9, 0.0 }
  0x38   :  { %v88_v10 = vpop.eup %87 }
  0x39   :  { %v90_v12 = vpop.eup %89  ;;  %v51_v13 = vmul.f32 %v88_v10, %v48_v8 }
  0x3a   :  { %v58_v15 = vmul.f32 %v90_v12, %v49_v9 }
  0x3b   :  { %v53_v16 = vsel %vm52_vm0, %v48_v8, %v51_v13 }
  0x3c   :  { %v56_v17 = vsel %vm54_vm1, %v55_v11, %v53_v16  ;;  %v60_v18 = vsel %vm59_vm2, %v49_v9, %v58_v15 }
  0x3d   :  { %v63_v19 = vsel %vm61_vm3, %v62_v14, %v60_v18 }
  0x3e   :  { %v64_v20 = vadd.f32 %v63_v19, %v56_v17 }
  0x40   :  { %65 = vst [vmem:[#allocation7] sm:$0xff] %v64_v20 }
  0x41   :  { %146 = shalt.err (!%p143_p6)
}
  0x42   :  { %s147_s10 = scalar_lea.hbm %s221_s2, 128 }
  0x43   :  { %p148_p7 = scmp.ne.s32.totalorder %s221_s2, %s147_s10  ;;  %p151_p8 = scmp.lt.u32.totalorder %s147_s10, %s221_s2 }
  0x45   :  { %p153_p9 = pnand %p151_p8, %p148_p7 }
  0x47   :  { %156 = shalt.err (!%p153_p9)
}
  0x48   :  { %75 = dma.vmem_to_hbm [thread:$0]  %s73_s6, 128, %s221_s2, [#allocation4]  }
  0x49   :  { %161 = dma.done.wait [#allocation4], 128  }
  0x4a   :  { %162 = vsyncadd [#allocation4], 4294967168 }
  0x4b   :  { %79 = vsyncpa [#allocation3], 1 }
  0x4c   :  { %80 = vsyncpa [#allocation6], 1 }
  0x4d   :  { %81 = vsyncpa [#allocation4], 1 }

</bundles_post_ra>
